<compile_context>
chip_gen: v5e
topology: v5e:2x2
jax: 0.10.0
libtpu: 0.0.40
codegen_flags: <defaults>
</compile_context>

<pallas_src>
import numpy as np
import jax
import jax.numpy as jnp
from jax.experimental import pallas as pl
from jax.experimental.pallas import tpu as pltpu


# --------------------------- static layout helpers ---------------------------

def _build_row_orders(dim, num_layers):
    """Per-level spatial row orderings (numpy, trace-time constants).

    ords[lev] has shape (S_lev, 2) giving the (h, w) coordinate (at resolution dim/2**lev)
    of each activation row.  The final level (last conv output) is row-major; every earlier
    level is the 4-way parity-block ordering that lets the next conv layer consume its four
    kernel taps as contiguous row slices.
    """
    ords = [None] * (num_layers + 1)
    w_last = dim >> num_layers
    hh = np.repeat(np.arange(w_last), w_last)
    ww = np.tile(np.arange(w_last), w_last)
    ords[num_layers] = np.stack([hh, ww], axis=1).astype(np.int64)
    for lev in range(num_layers - 1, -1, -1):
        nxt = ords[lev + 1]
        blocks = []
        for kh in (0, 1):
            for kw in (0, 1):
                blocks.append(np.stack([2 * nxt[:, 0] + kh, 2 * nxt[:, 1] + kw], axis=1))
        ords[lev] = np.concatenate(blocks, axis=0)
    return ords


# ------------------------------- fused kernel --------------------------------

def _make_fused_kernel(num_layers, channels, spatials):
    """Kernel: all conv+BN+ReLU layers plus the final Linear, for ONE batch element."""

    def kernel(x_ref, *refs):
        conv_refs = refs[:2 * num_layers]
        g_ref = refs[2 * num_layers]          # (S_L, C_L, NC) permuted fc weight
        fcb_ref = refs[2 * num_layers + 1]    # (1, NC) fc bias (f32)
        o_ref = refs[2 * num_layers + 2]      # (1, 1, NC) output block

        a = x_ref[0]                          # (S_0, C_0), compute dtype
        for l in range(num_layers):
            w = conv_refs[2 * l][...]         # (4*C_in, C_out), compute dtype
            shift = conv_refs[2 * l + 1][...]  # (1, C_out) f32: folded BN + conv bias
            c_in, c_out = channels[l], channels[l + 1]
            s_out = spatials[l + 1]
            acc = jnp.zeros((s_out, c_out), jnp.float32)
            for p in range(4):                # 4 kernel taps == 4 contiguous row blocks
                acc = acc + jnp.dot(a[p * s_out:(p + 1) * s_out, :],
                                    w[p * c_in:(p + 1) * c_in, :],
                                    preferred_element_type=jnp.float32)
            a = jnp.maximum(acc + shift, 0.0).astype(w.dtype)   # f32 epilogue, cast for MXU

        # Final Linear.  `a` is (S_L, C_L) with rows = spatial positions in row-major order;
        # fc_w was re-grouped on the host as g[s] = (C_L, NC), so logits = b + sum_s a[s] @ g[s].
        out = fcb_ref[...]                    # (1, NC) f32
        for s in range(spatials[num_layers]):
            out = out + jnp.dot(a[s:s + 1, :], g_ref[s],
                                preferred_element_type=jnp.float32)
        o_ref[0] = out.astype(o_ref.dtype)

    return kernel


# ------------------------------ forward wrapper ------------------------------

def cnn_multiclass_forward(params, x, *, use_bf16=True, eps=1e-5):
    B, C0, H, W = x.shape
    convs = params["convs"]
    L = len(convs)
    assert H == W and H % (2 ** L) == 0, (
        "spatial dims must be square and divisible by 2**num_layers")
    # TODO(synk): PyTorch Conv2d(k=2, s=2) silently floors odd spatial dims; not supported here.
    D = H
    compute_dtype = jnp.bfloat16 if use_bf16 else jnp.float32

    channels = [C0] + [p["w"].shape[0] for p in convs]
    spatials = [(D >> l) ** 2 for l in range(L + 1)]       # per batch element
    NC = params["fc_w"].shape[0]
    CL, SL = channels[L], spatials[L]

    # ---- host-side glue (tiny, one-time): row permutation, weight permutes, BN fold ----
    ords = _build_row_orders(D, L)
    perm0 = ords[0][:, 0] * D + ords[0][:, 1]              # static numpy index array

    x_rows = jnp.transpose(x, (0, 2, 3, 1)).reshape(B, D * D, C0)
    a0 = x_rows[:, perm0, :].astype(compute_dtype)         # (B, S_0, C_0), parity-block order

    inputs = [a0]
    in_specs = [pl.BlockSpec((1, spatials[0], C0), lambda b: (b, 0, 0))]

    for l, p in enumerate(convs):
        c_in, c_out = channels[l], channels[l + 1]
        sc = p["gamma"] * jax.lax.rsqrt(p["var"] + eps)            # BN (eval) fold
        w_fold = p["w"] * sc[:, None, None, None]                  # (C_out, C_in, 2, 2)
        shift = (p["b"] - p["mean"]) * sc + p["beta"]              # conv bias + BN shift
        # Rows ordered (kh, kw, c_in): kernel-tap-major, matching the activation row blocks.
        w_blk = jnp.transpose(w_fold, (2, 3, 1, 0)).reshape(4 * c_in, c_out)
        inputs += [w_blk.astype(compute_dtype), shift.reshape(1, c_out)]
        in_specs += [pl.BlockSpec((4 * c_in, c_out), lambda b: (0, 0)),
                     pl.BlockSpec((1, c_out), lambda b: (0, 0))]

    # nn.Flatten(NCHW) feature index is c*S_L + s; our last activation has rows = s
    # (row-major) and cols = c, so permute fc_w once into g[s, c, n].
    g = jnp.transpose(params["fc_w"].reshape(NC, CL, SL), (2, 1, 0)).astype(compute_dtype)
    fcb = params["fc_b"].reshape(1, NC)
    inputs += [g, fcb]
    in_specs += [pl.BlockSpec((SL, CL, NC), lambda b: (0, 0, 0)),
                 pl.BlockSpec((1, NC), lambda b: (0, 0))]

    flops = 2 * B * (sum(spatials[l + 1] * 4 * channels[l] * channels[l + 1]
                         for l in range(L)) + SL * CL * NC)
    bytes_accessed = int(sum(v.size * v.dtype.itemsize for v in inputs) + B * NC * 4)

    out = pl.pallas_call(
        _make_fused_kernel(L, channels, spatials),
        out_shape=jax.ShapeDtypeStruct((B, 1, NC), jnp.float32),
        grid=(B,),
        in_specs=in_specs,
        out_specs=pl.BlockSpec((1, 1, NC), lambda b: (b, 0, 0)),
        compiler_params=pltpu.CompilerParams(
            dimension_semantics=("parallel",),        # v7x megacore: split batch over TCs
            vmem_limit_bytes=32 * 1024 * 1024),
        cost_estimate=pl.CostEstimate(flops=flops, transcendentals=0,
                                      bytes_accessed=bytes_accessed),
    )(*inputs)
    return out.reshape(B, NC)


# ----------------------------- params & reference ----------------------------

def init_params(key, num_layers, max_filters, num_output_classes,
                input_dimension, input_channels):
    assert max_filters % num_layers == 0
    params = {"convs": []}
    in_ch = input_channels
    out_ch = max_filters // 2 ** num_layers
    dim = input_dimension
    for i in range(num_layers):
        key, k_w, k_b, k_g, k_bt, k_m, k_v = jax.random.split(key, 7)
        params["convs"].append({
            "w": jax.random.normal(k_w, (out_ch, in_ch, 2, 2), jnp.float32) * 0.2,
            "b": jax.random.normal(k_b, (out_ch,), jnp.float32) * 0.1,
            "gamma": 1.0 + 0.1 * jax.random.normal(k_g, (out_ch,), jnp.float32),
            "beta": 0.1 * jax.random.normal(k_bt, (out_ch,), jnp.float32),
            "mean": 0.1 * jax.random.normal(k_m, (out_ch,), jnp.float32),
            "var": jax.random.uniform(k_v, (out_ch,), jnp.float32, minval=0.5, maxval=1.5),
        })
        if i != num_layers - 1:
            in_ch = out_ch
            out_ch = out_ch * 2
        dim = dim // 2
    in_features = out_ch * dim * dim
    key, k_fw, k_fb = jax.random.split(key, 3)
    params["fc_w"] = jax.random.normal(k_fw, (num_output_classes, in_features), jnp.float32) * 0.1
    params["fc_b"] = jax.random.normal(k_fb, (num_output_classes,), jnp.float32) * 0.1
    return params


def _reference_forward(params, x, eps=1e-5):
    """Pure-JAX (f32) reference mirroring the PyTorch module (BN in eval mode)."""
    a = x
    for p in params["convs"]:
        a = jax.lax.conv_general_dilated(a, p["w"], window_strides=(2, 2), padding="VALID",
                                         dimension_numbers=("NCHW", "OIHW", "NCHW"))
        a = a + p["b"][None, :, None, None]
        sc = p["gamma"] * jax.lax.rsqrt(p["var"] + eps)
        a = (a - p["mean"][None, :, None, None]) * sc[None, :, None, None] \
            + p["beta"][None, :, None, None]
        a = jnp.maximum(a, 0.0)
    a = a.reshape(a.shape[0], -1)
    return a @ params["fc_w"].T + params["fc_b"]


# ---------------------------------- Main ------------------------------------

if __name__ == "__main__":
    # Small config consistent with the module:
    #   num_layers=2, max_filters=8 -> conv channels 2 then 4
    #   input_dimension=16, input_channels=4, num_output_classes=3
    num_layers = 2
    max_filters = 8
    num_output_classes = 3
    input_dimension = 16
    input_channels = 4
    batch = 2

    key = jax.random.PRNGKey(0)
    key, k_x = jax.random.split(key)
    x = jax.random.normal(k_x, (batch, input_channels,
                                input_dimension, input_dimension), jnp.float32)
    params = init_params(key, num_layers, max_filters, num_output_classes,
                         input_dimension, input_channels)

    # TODO(synk): BatchNorm2d is implemented in eval mode (running stats); PyTorch's
    # default training-mode batch statistics are not reproduced.
    out = jax.jit(cnn_multiclass_forward)(params, x)
    out = jax.block_until_ready(out)
    assert out.shape == (batch, num_output_classes)

    ref = _reference_forward(params, x)
    np.testing.assert_allclose(np.asarray(out), np.asarray(ref), rtol=5e-2, atol=5e-2)
    print("KERNEL_OK")
</pallas_src>

<mosaic_0001>
module attributes {stable_mosaic.version = 11 : i64} {
  func.func @kernel(%arg0: i32, %arg1: memref<1x256x4xbf16, #tpu.memory_space<vmem>>, %arg2: memref<16x2xbf16, #tpu.memory_space<vmem>>, %arg3: memref<1x2xf32, #tpu.memory_space<vmem>>, %arg4: memref<8x4xbf16, #tpu.memory_space<vmem>>, %arg5: memref<1x4xf32, #tpu.memory_space<vmem>>, %arg6: memref<16x4x3xbf16, #tpu.memory_space<vmem>>, %arg7: memref<1x3xf32, #tpu.memory_space<vmem>>, %arg8: memref<1x1x3xf32, #tpu.memory_space<vmem>>) attributes {dimension_semantics = [#tpu.dimension_semantics<parallel>], iteration_bounds = array<i64: 2>, scalar_prefetch = 0 : i64, scratch_operands = 0 : i64, tpu.core_type = #tpu.core_type<tc>, window_params = [{transform_indices = @transform_0, window_bounds = array<i64: 1, 256, 4>}, {pipeline_mode = #tpu.pipeline_mode<synchronous>, transform_indices = @transform_1, window_bounds = array<i64: 16, 2>}, {pipeline_mode = #tpu.pipeline_mode<synchronous>, transform_indices = @transform_2, window_bounds = array<i64: 1, 2>}, {pipeline_mode = #tpu.pipeline_mode<synchronous>, transform_indices = @transform_3, window_bounds = array<i64: 8, 4>}, {pipeline_mode = #tpu.pipeline_mode<synchronous>, transform_indices = @transform_4, window_bounds = array<i64: 1, 4>}, {pipeline_mode = #tpu.pipeline_mode<synchronous>, transform_indices = @transform_5, window_bounds = array<i64: 16, 4, 3>}, {pipeline_mode = #tpu.pipeline_mode<synchronous>, transform_indices = @transform_6, window_bounds = array<i64: 1, 3>}, {transform_indices = @transform_7, window_bounds = array<i64: 1, 1, 3>}]} {
    %c0 = arith.constant 0 : index
    %c0_0 = arith.constant 0 : index
    %c0_1 = arith.constant 0 : index
    %0 = vector.load %arg1[%c0, %c0_0, %c0_1] : memref<1x256x4xbf16, #tpu.memory_space<vmem>>, vector<1x256x4xbf16>
    %1 = vector.shape_cast %0 : vector<1x256x4xbf16> to vector<256x4xbf16>
    %c0_2 = arith.constant 0 : index
    %c0_3 = arith.constant 0 : index
    %2 = vector.load %arg2[%c0_2, %c0_3] : memref<16x2xbf16, #tpu.memory_space<vmem>>, vector<16x2xbf16>
    %c0_4 = arith.constant 0 : index
    %c0_5 = arith.constant 0 : index
    %3 = vector.load %arg3[%c0_4, %c0_5] : memref<1x2xf32, #tpu.memory_space<vmem>>, vector<1x2xf32>
    %cst = arith.constant 0.000000e+00 : f32
    %4 = vector.broadcast %cst : f32 to vector<64x2xf32>
    %5 = vector.extract_strided_slice %1 {offsets = [0, 0], sizes = [64, 4], strides = [1, 1]} : vector<256x4xbf16> to vector<64x4xbf16>
    %6 = vector.extract_strided_slice %2 {offsets = [0, 0], sizes = [4, 2], strides = [1, 1]} : vector<16x2xbf16> to vector<4x2xbf16>
    %cst_6 = arith.constant dense<0.000000e+00> : vector<64x2xf32>
    %7 = tpu.matmul %5, %6, %cst_6 {dimension_numbers = #tpu.dot_dimension_numbers<[1], [0], [0], [1], [0, 0, 1, 1], [], []>} : vector<64x4xbf16>, vector<4x2xbf16>, vector<64x2xf32> -> vector<64x2xf32>
    %8 = arith.addf %4, %7 : vector<64x2xf32>
    %9 = vector.extract_strided_slice %1 {offsets = [64, 0], sizes = [64, 4], strides = [1, 1]} : vector<256x4xbf16> to vector<64x4xbf16>
    %10 = vector.extract_strided_slice %2 {offsets = [4, 0], sizes = [4, 2], strides = [1, 1]} : vector<16x2xbf16> to vector<4x2xbf16>
    %cst_7 = arith.constant dense<0.000000e+00> : vector<64x2xf32>
    %11 = tpu.matmul %9, %10, %cst_7 {dimension_numbers = #tpu.dot_dimension_numbers<[1], [0], [0], [1], [0, 0, 1, 1], [], []>} : vector<64x4xbf16>, vector<4x2xbf16>, vector<64x2xf32> -> vector<64x2xf32>
    %12 = arith.addf %8, %11 : vector<64x2xf32>
    %13 = vector.extract_strided_slice %1 {offsets = [128, 0], sizes = [64, 4], strides = [1, 1]} : vector<256x4xbf16> to vector<64x4xbf16>
    %14 = vector.extract_strided_slice %2 {offsets = [8, 0], sizes = [4, 2], strides = [1, 1]} : vector<16x2xbf16> to vector<4x2xbf16>
    %cst_8 = arith.constant dense<0.000000e+00> : vector<64x2xf32>
    %15 = tpu.matmul %13, %14, %cst_8 {dimension_numbers = #tpu.dot_dimension_numbers<[1], [0], [0], [1], [0, 0, 1, 1], [], []>} : vector<64x4xbf16>, vector<4x2xbf16>, vector<64x2xf32> -> vector<64x2xf32>
    %16 = arith.addf %12, %15 : vector<64x2xf32>
    %17 = vector.extract_strided_slice %1 {offsets = [192, 0], sizes = [64, 4], strides = [1, 1]} : vector<256x4xbf16> to vector<64x4xbf16>
    %18 = vector.extract_strided_slice %2 {offsets = [12, 0], sizes = [4, 2], strides = [1, 1]} : vector<16x2xbf16> to vector<4x2xbf16>
    %cst_9 = arith.constant dense<0.000000e+00> : vector<64x2xf32>
    %19 = tpu.matmul %17, %18, %cst_9 {dimension_numbers = #tpu.dot_dimension_numbers<[1], [0], [0], [1], [0, 0, 1, 1], [], []>} : vector<64x4xbf16>, vector<4x2xbf16>, vector<64x2xf32> -> vector<64x2xf32>
    %20 = arith.addf %16, %19 : vector<64x2xf32>
    %21 = vector.broadcast %3 : vector<1x2xf32> to vector<64x2xf32>
    %22 = arith.addf %20, %21 : vector<64x2xf32>
    %cst_10 = arith.constant 0.000000e+00 : f32
    %23 = vector.broadcast %cst_10 : f32 to vector<64x2xf32>
    %24 = arith.maximumf %22, %23 : vector<64x2xf32>
    %25 = arith.truncf %24 : vector<64x2xf32> to vector<64x2xbf16>
    %c0_11 = arith.constant 0 : index
    %c0_12 = arith.constant 0 : index
    %26 = vector.load %arg4[%c0_11, %c0_12] : memref<8x4xbf16, #tpu.memory_space<vmem>>, vector<8x4xbf16>
    %c0_13 = arith.constant 0 : index
    %c0_14 = arith.constant 0 : index
    %27 = vector.load %arg5[%c0_13, %c0_14] : memref<1x4xf32, #tpu.memory_space<vmem>>, vector<1x4xf32>
    %cst_15 = arith.constant 0.000000e+00 : f32
    %28 = vector.broadcast %cst_15 : f32 to vector<16x4xf32>
    %29 = vector.extract_strided_slice %25 {offsets = [0, 0], sizes = [16, 2], strides = [1, 1]} : vector<64x2xbf16> to vector<16x2xbf16>
    %30 = vector.extract_strided_slice %26 {offsets = [0, 0], sizes = [2, 4], strides = [1, 1]} : vector<8x4xbf16> to vector<2x4xbf16>
    %cst_16 = arith.constant dense<0.000000e+00> : vector<16x4xf32>
    %31 = tpu.matmul %29, %30, %cst_16 {dimension_numbers = #tpu.dot_dimension_numbers<[1], [0], [0], [1], [0, 0, 1, 1], [], []>} : vector<16x2xbf16>, vector<2x4xbf16>, vector<16x4xf32> -> vector<16x4xf32>
    %32 = arith.addf %28, %31 : vector<16x4xf32>
    %33 = vector.extract_strided_slice %25 {offsets = [16, 0], sizes = [16, 2], strides = [1, 1]} : vector<64x2xbf16> to vector<16x2xbf16>
    %34 = vector.extract_strided_slice %26 {offsets = [2, 0], sizes = [2, 4], strides = [1, 1]} : vector<8x4xbf16> to vector<2x4xbf16>
    %cst_17 = arith.constant dense<0.000000e+00> : vector<16x4xf32>
    %35 = tpu.matmul %33, %34, %cst_17 {dimension_numbers = #tpu.dot_dimension_numbers<[1], [0], [0], [1], [0, 0, 1, 1], [], []>} : vector<16x2xbf16>, vector<2x4xbf16>, vector<16x4xf32> -> vector<16x4xf32>
    %36 = arith.addf %32, %35 : vector<16x4xf32>
    %37 = vector.extract_strided_slice %25 {offsets = [32, 0], sizes = [16, 2], strides = [1, 1]} : vector<64x2xbf16> to vector<16x2xbf16>
    %38 = vector.extract_strided_slice %26 {offsets = [4, 0], sizes = [2, 4], strides = [1, 1]} : vector<8x4xbf16> to vector<2x4xbf16>
    %cst_18 = arith.constant dense<0.000000e+00> : vector<16x4xf32>
    %39 = tpu.matmul %37, %38, %cst_18 {dimension_numbers = #tpu.dot_dimension_numbers<[1], [0], [0], [1], [0, 0, 1, 1], [], []>} : vector<16x2xbf16>, vector<2x4xbf16>, vector<16x4xf32> -> vector<16x4xf32>
    %40 = arith.addf %36, %39 : vector<16x4xf32>
    %41 = vector.extract_strided_slice %25 {offsets = [48, 0], sizes = [16, 2], strides = [1, 1]} : vector<64x2xbf16> to vector<16x2xbf16>
    %42 = vector.extract_strided_slice %26 {offsets = [6, 0], sizes = [2, 4], strides = [1, 1]} : vector<8x4xbf16> to vector<2x4xbf16>
    %cst_19 = arith.constant dense<0.000000e+00> : vector<16x4xf32>
    %43 = tpu.matmul %41, %42, %cst_19 {dimension_numbers = #tpu.dot_dimension_numbers<[1], [0], [0], [1], [0, 0, 1, 1], [], []>} : vector<16x2xbf16>, vector<2x4xbf16>, vector<16x4xf32> -> vector<16x4xf32>
    %44 = arith.addf %40, %43 : vector<16x4xf32>
    %45 = vector.broadcast %27 : vector<1x4xf32> to vector<16x4xf32>
    %46 = arith.addf %44, %45 : vector<16x4xf32>
    %cst_20 = arith.constant 0.000000e+00 : f32
    %47 = vector.broadcast %cst_20 : f32 to vector<16x4xf32>
    %48 = arith.maximumf %46, %47 : vector<16x4xf32>
    %49 = arith.truncf %48 : vector<16x4xf32> to vector<16x4xbf16>
    %c0_21 = arith.constant 0 : index
    %c0_22 = arith.constant 0 : index
    %50 = vector.load %arg7[%c0_21, %c0_22] : memref<1x3xf32, #tpu.memory_space<vmem>>, vector<1x3xf32>
    %51 = vector.extract_strided_slice %49 {offsets = [0, 0], sizes = [1, 4], strides = [1, 1]} : vector<16x4xbf16> to vector<1x4xbf16>
    %c0_23 = arith.constant 0 : index
    %c0_24 = arith.constant 0 : index
    %c0_25 = arith.constant 0 : index
    %52 = vector.load %arg6[%c0_23, %c0_24, %c0_25] : memref<16x4x3xbf16, #tpu.memory_space<vmem>>, vector<1x4x3xbf16>
    %53 = vector.shape_cast %52 : vector<1x4x3xbf16> to vector<4x3xbf16>
    %cst_26 = arith.constant dense<0.000000e+00> : vector<1x3xf32>
    %54 = tpu.matmul %51, %53, %cst_26 {dimension_numbers = #tpu.dot_dimension_numbers<[1], [0], [0], [1], [0, 0, 1, 1], [], []>} : vector<1x4xbf16>, vector<4x3xbf16>, vector<1x3xf32> -> vector<1x3xf32>
    %55 = arith.addf %50, %54 : vector<1x3xf32>
    %56 = vector.extract_strided_slice %49 {offsets = [1, 0], sizes = [1, 4], strides = [1, 1]} : vector<16x4xbf16> to vector<1x4xbf16>
    %c1 = arith.constant 1 : index
    %c0_27 = arith.constant 0 : index
    %c0_28 = arith.constant 0 : index
    %57 = vector.load %arg6[%c1, %c0_27, %c0_28] : memref<16x4x3xbf16, #tpu.memory_space<vmem>>, vector<1x4x3xbf16>
    %58 = vector.shape_cast %57 : vector<1x4x3xbf16> to vector<4x3xbf16>
    %cst_29 = arith.constant dense<0.000000e+00> : vector<1x3xf32>
    %59 = tpu.matmul %56, %58, %cst_29 {dimension_numbers = #tpu.dot_dimension_numbers<[1], [0], [0], [1], [0, 0, 1, 1], [], []>} : vector<1x4xbf16>, vector<4x3xbf16>, vector<1x3xf32> -> vector<1x3xf32>
    %60 = arith.addf %55, %59 : vector<1x3xf32>
    %61 = vector.extract_strided_slice %49 {offsets = [2, 0], sizes = [1, 4], strides = [1, 1]} : vector<16x4xbf16> to vector<1x4xbf16>
    %c2 = arith.constant 2 : index
    %c0_30 = arith.constant 0 : index
    %c0_31 = arith.constant 0 : index
    %62 = vector.load %arg6[%c2, %c0_30, %c0_31] : memref<16x4x3xbf16, #tpu.memory_space<vmem>>, vector<1x4x3xbf16>
    %63 = vector.shape_cast %62 : vector<1x4x3xbf16> to vector<4x3xbf16>
    %cst_32 = arith.constant dense<0.000000e+00> : vector<1x3xf32>
    %64 = tpu.matmul %61, %63, %cst_32 {dimension_numbers = #tpu.dot_dimension_numbers<[1], [0], [0], [1], [0, 0, 1, 1], [], []>} : vector<1x4xbf16>, vector<4x3xbf16>, vector<1x3xf32> -> vector<1x3xf32>
    %65 = arith.addf %60, %64 : vector<1x3xf32>
    %66 = vector.extract_strided_slice %49 {offsets = [3, 0], sizes = [1, 4], strides = [1, 1]} : vector<16x4xbf16> to vector<1x4xbf16>
    %c3 = arith.constant 3 : index
    %c0_33 = arith.constant 0 : index
    %c0_34 = arith.constant 0 : index
    %67 = vector.load %arg6[%c3, %c0_33, %c0_34] : memref<16x4x3xbf16, #tpu.memory_space<vmem>>, vector<1x4x3xbf16>
    %68 = vector.shape_cast %67 : vector<1x4x3xbf16> to vector<4x3xbf16>
    %cst_35 = arith.constant dense<0.000000e+00> : vector<1x3xf32>
    %69 = tpu.matmul %66, %68, %cst_35 {dimension_numbers = #tpu.dot_dimension_numbers<[1], [0], [0], [1], [0, 0, 1, 1], [], []>} : vector<1x4xbf16>, vector<4x3xbf16>, vector<1x3xf32> -> vector<1x3xf32>
    %70 = arith.addf %65, %69 : vector<1x3xf32>
    %71 = vector.extract_strided_slice %49 {offsets = [4, 0], sizes = [1, 4], strides = [1, 1]} : vector<16x4xbf16> to vector<1x4xbf16>
    %c4 = arith.constant 4 : index
    %c0_36 = arith.constant 0 : index
    %c0_37 = arith.constant 0 : index
    %72 = vector.load %arg6[%c4, %c0_36, %c0_37] : memref<16x4x3xbf16, #tpu.memory_space<vmem>>, vector<1x4x3xbf16>
    %73 = vector.shape_cast %72 : vector<1x4x3xbf16> to vector<4x3xbf16>
    %cst_38 = arith.constant dense<0.000000e+00> : vector<1x3xf32>
    %74 = tpu.matmul %71, %73, %cst_38 {dimension_numbers = #tpu.dot_dimension_numbers<[1], [0], [0], [1], [0, 0, 1, 1], [], []>} : vector<1x4xbf16>, vector<4x3xbf16>, vector<1x3xf32> -> vector<1x3xf32>
    %75 = arith.addf %70, %74 : vector<1x3xf32>
    %76 = vector.extract_strided_slice %49 {offsets = [5, 0], sizes = [1, 4], strides = [1, 1]} : vector<16x4xbf16> to vector<1x4xbf16>
    %c5 = arith.constant 5 : index
    %c0_39 = arith.constant 0 : index
    %c0_40 = arith.constant 0 : index
    %77 = vector.load %arg6[%c5, %c0_39, %c0_40] : memref<16x4x3xbf16, #tpu.memory_space<vmem>>, vector<1x4x3xbf16>
    %78 = vector.shape_cast %77 : vector<1x4x3xbf16> to vector<4x3xbf16>
    %cst_41 = arith.constant dense<0.000000e+00> : vector<1x3xf32>
    %79 = tpu.matmul %76, %78, %cst_41 {dimension_numbers = #tpu.dot_dimension_numbers<[1], [0], [0], [1], [0, 0, 1, 1], [], []>} : vector<1x4xbf16>, vector<4x3xbf16>, vector<1x3xf32> -> vector<1x3xf32>
    %80 = arith.addf %75, %79 : vector<1x3xf32>
    %81 = vector.extract_strided_slice %49 {offsets = [6, 0], sizes = [1, 4], strides = [1, 1]} : vector<16x4xbf16> to vector<1x4xbf16>
    %c6 = arith.constant 6 : index
    %c0_42 = arith.constant 0 : index
    %c0_43 = arith.constant 0 : index
    %82 = vector.load %arg6[%c6, %c0_42, %c0_43] : memref<16x4x3xbf16, #tpu.memory_space<vmem>>, vector<1x4x3xbf16>
    %83 = vector.shape_cast %82 : vector<1x4x3xbf16> to vector<4x3xbf16>
    %cst_44 = arith.constant dense<0.000000e+00> : vector<1x3xf32>
    %84 = tpu.matmul %81, %83, %cst_44 {dimension_numbers = #tpu.dot_dimension_numbers<[1], [0], [0], [1], [0, 0, 1, 1], [], []>} : vector<1x4xbf16>, vector<4x3xbf16>, vector<1x3xf32> -> vector<1x3xf32>
    %85 = arith.addf %80, %84 : vector<1x3xf32>
    %86 = vector.extract_strided_slice %49 {offsets = [7, 0], sizes = [1, 4], strides = [1, 1]} : vector<16x4xbf16> to vector<1x4xbf16>
    %c7 = arith.constant 7 : index
    %c0_45 = arith.constant 0 : index
    %c0_46 = arith.constant 0 : index
    %87 = vector.load %arg6[%c7, %c0_45, %c0_46] : memref<16x4x3xbf16, #tpu.memory_space<vmem>>, vector<1x4x3xbf16>
    %88 = vector.shape_cast %87 : vector<1x4x3xbf16> to vector<4x3xbf16>
    %cst_47 = arith.constant dense<0.000000e+00> : vector<1x3xf32>
    %89 = tpu.matmul %86, %88, %cst_47 {dimension_numbers = #tpu.dot_dimension_numbers<[1], [0], [0], [1], [0, 0, 1, 1], [], []>} : vector<1x4xbf16>, vector<4x3xbf16>, vector<1x3xf32> -> vector<1x3xf32>
    %90 = arith.addf %85, %89 : vector<1x3xf32>
    %91 = vector.extract_strided_slice %49 {offsets = [8, 0], sizes = [1, 4], strides = [1, 1]} : vector<16x4xbf16> to vector<1x4xbf16>
    %c8 = arith.constant 8 : index
    %c0_48 = arith.constant 0 : index
    %c0_49 = arith.constant 0 : index
    %92 = vector.load %arg6[%c8, %c0_48, %c0_49] : memref<16x4x3xbf16, #tpu.memory_space<vmem>>, vector<1x4x3xbf16>
    %93 = vector.shape_cast %92 : vector<1x4x3xbf16> to vector<4x3xbf16>
    %cst_50 = arith.constant dense<0.000000e+00> : vector<1x3xf32>
    %94 = tpu.matmul %91, %93, %cst_50 {dimension_numbers = #tpu.dot_dimension_numbers<[1], [0], [0], [1], [0, 0, 1, 1], [], []>} : vector<1x4xbf16>, vector<4x3xbf16>, vector<1x3xf32> -> vector<1x3xf32>
    %95 = arith.addf %90, %94 : vector<1x3xf32>
    %96 = vector.extract_strided_slice %49 {offsets = [9, 0], sizes = [1, 4], strides = [1, 1]} : vector<16x4xbf16> to vector<1x4xbf16>
    %c9 = arith.constant 9 : index
    %c0_51 = arith.constant 0 : index
    %c0_52 = arith.constant 0 : index
    %97 = vector.load %arg6[%c9, %c0_51, %c0_52] : memref<16x4x3xbf16, #tpu.memory_space<vmem>>, vector<1x4x3xbf16>
    %98 = vector.shape_cast %97 : vector<1x4x3xbf16> to vector<4x3xbf16>
    %cst_53 = arith.constant dense<0.000000e+00> : vector<1x3xf32>
    %99 = tpu.matmul %96, %98, %cst_53 {dimension_numbers = #tpu.dot_dimension_numbers<[1], [0], [0], [1], [0, 0, 1, 1], [], []>} : vector<1x4xbf16>, vector<4x3xbf16>, vector<1x3xf32> -> vector<1x3xf32>
    %100 = arith.addf %95, %99 : vector<1x3xf32>
    %101 = vector.extract_strided_slice %49 {offsets = [10, 0], sizes = [1, 4], strides = [1, 1]} : vector<16x4xbf16> to vector<1x4xbf16>
    %c10 = arith.constant 10 : index
    %c0_54 = arith.constant 0 : index
    %c0_55 = arith.constant 0 : index
    %102 = vector.load %arg6[%c10, %c0_54, %c0_55] : memref<16x4x3xbf16, #tpu.memory_space<vmem>>, vector<1x4x3xbf16>
    %103 = vector.shape_cast %102 : vector<1x4x3xbf16> to vector<4x3xbf16>
    %cst_56 = arith.constant dense<0.000000e+00> : vector<1x3xf32>
    %104 = tpu.matmul %101, %103, %cst_56 {dimension_numbers = #tpu.dot_dimension_numbers<[1], [0], [0], [1], [0, 0, 1, 1], [], []>} : vector<1x4xbf16>, vector<4x3xbf16>, vector<1x3xf32> -> vector<1x3xf32>
    %105 = arith.addf %100, %104 : vector<1x3xf32>
    %106 = vector.extract_strided_slice %49 {offsets = [11, 0], sizes = [1, 4], strides = [1, 1]} : vector<16x4xbf16> to vector<1x4xbf16>
    %c11 = arith.constant 11 : index
    %c0_57 = arith.constant 0 : index
    %c0_58 = arith.constant 0 : index
    %107 = vector.load %arg6[%c11, %c0_57, %c0_58] : memref<16x4x3xbf16, #tpu.memory_space<vmem>>, vector<1x4x3xbf16>
    %108 = vector.shape_cast %107 : vector<1x4x3xbf16> to vector<4x3xbf16>
    %cst_59 = arith.constant dense<0.000000e+00> : vector<1x3xf32>
    %109 = tpu.matmul %106, %108, %cst_59 {dimension_numbers = #tpu.dot_dimension_numbers<[1], [0], [0], [1], [0, 0, 1, 1], [], []>} : vector<1x4xbf16>, vector<4x3xbf16>, vector<1x3xf32> -> vector<1x3xf32>
    %110 = arith.addf %105, %109 : vector<1x3xf32>
    %111 = vector.extract_strided_slice %49 {offsets = [12, 0], sizes = [1, 4], strides = [1, 1]} : vector<16x4xbf16> to vector<1x4xbf16>
    %c12 = arith.constant 12 : index
    %c0_60 = arith.constant 0 : index
    %c0_61 = arith.constant 0 : index
    %112 = vector.load %arg6[%c12, %c0_60, %c0_61] : memref<16x4x3xbf16, #tpu.memory_space<vmem>>, vector<1x4x3xbf16>
    %113 = vector.shape_cast %112 : vector<1x4x3xbf16> to vector<4x3xbf16>
    %cst_62 = arith.constant dense<0.000000e+00> : vector<1x3xf32>
    %114 = tpu.matmul %111, %113, %cst_62 {dimension_numbers = #tpu.dot_dimension_numbers<[1], [0], [0], [1], [0, 0, 1, 1], [], []>} : vector<1x4xbf16>, vector<4x3xbf16>, vector<1x3xf32> -> vector<1x3xf32>
    %115 = arith.addf %110, %114 : vector<1x3xf32>
    %116 = vector.extract_strided_slice %49 {offsets = [13, 0], sizes = [1, 4], strides = [1, 1]} : vector<16x4xbf16> to vector<1x4xbf16>
    %c13 = arith.constant 13 : index
    %c0_63 = arith.constant 0 : index
    %c0_64 = arith.constant 0 : index
    %117 = vector.load %arg6[%c13, %c0_63, %c0_64] : memref<16x4x3xbf16, #tpu.memory_space<vmem>>, vector<1x4x3xbf16>
    %118 = vector.shape_cast %117 : vector<1x4x3xbf16> to vector<4x3xbf16>
    %cst_65 = arith.constant dense<0.000000e+00> : vector<1x3xf32>
    %119 = tpu.matmul %116, %118, %cst_65 {dimension_numbers = #tpu.dot_dimension_numbers<[1], [0], [0], [1], [0, 0, 1, 1], [], []>} : vector<1x4xbf16>, vector<4x3xbf16>, vector<1x3xf32> -> vector<1x3xf32>
    %120 = arith.addf %115, %119 : vector<1x3xf32>
    %121 = vector.extract_strided_slice %49 {offsets = [14, 0], sizes = [1, 4], strides = [1, 1]} : vector<16x4xbf16> to vector<1x4xbf16>
    %c14 = arith.constant 14 : index
    %c0_66 = arith.constant 0 : index
    %c0_67 = arith.constant 0 : index
    %122 = vector.load %arg6[%c14, %c0_66, %c0_67] : memref<16x4x3xbf16, #tpu.memory_space<vmem>>, vector<1x4x3xbf16>
    %123 = vector.shape_cast %122 : vector<1x4x3xbf16> to vector<4x3xbf16>
    %cst_68 = arith.constant dense<0.000000e+00> : vector<1x3xf32>
    %124 = tpu.matmul %121, %123, %cst_68 {dimension_numbers = #tpu.dot_dimension_numbers<[1], [0], [0], [1], [0, 0, 1, 1], [], []>} : vector<1x4xbf16>, vector<4x3xbf16>, vector<1x3xf32> -> vector<1x3xf32>
    %125 = arith.addf %120, %124 : vector<1x3xf32>
    %126 = vector.extract_strided_slice %49 {offsets = [15, 0], sizes = [1, 4], strides = [1, 1]} : vector<16x4xbf16> to vector<1x4xbf16>
    %c15 = arith.constant 15 : index
    %c0_69 = arith.constant 0 : index
    %c0_70 = arith.constant 0 : index
    %127 = vector.load %arg6[%c15, %c0_69, %c0_70] : memref<16x4x3xbf16, #tpu.memory_space<vmem>>, vector<1x4x3xbf16>
    %128 = vector.shape_cast %127 : vector<1x4x3xbf16> to vector<4x3xbf16>
    %cst_71 = arith.constant dense<0.000000e+00> : vector<1x3xf32>
    %129 = tpu.matmul %126, %128, %cst_71 {dimension_numbers = #tpu.dot_dimension_numbers<[1], [0], [0], [1], [0, 0, 1, 1], [], []>} : vector<1x4xbf16>, vector<4x3xbf16>, vector<1x3xf32> -> vector<1x3xf32>
    %130 = arith.addf %125, %129 : vector<1x3xf32>
    %c0_72 = arith.constant 0 : index
    %c0_73 = arith.constant 0 : index
    %c0_74 = arith.constant 0 : index
    %131 = vector.load %arg8[%c0_72, %c0_73, %c0_74] : memref<1x1x3xf32, #tpu.memory_space<vmem>>, vector<1x1x3xf32>
    %132 = vector.shape_cast %131 : vector<1x1x3xf32> to vector<1x3xf32>
    %133 = vector.shape_cast %130 : vector<1x3xf32> to vector<1x1x3xf32>
    tpu.vector_store %arg8[%c0_72, %c0_73, %c0_74], %133 {strides = array<i32>} : memref<1x1x3xf32, #tpu.memory_space<vmem>>, vector<1x1x3xf32>,
    return
  }
  func.func @transform_0(%arg0: i32) -> (i32, i32, i32) {
    %c0_i32 = arith.constant 0 : i32
    %c0_i32_0 = arith.constant 0 : i32
    %c0_i32_1 = arith.constant 0 : i32
    return %arg0, %c0_i32, %c0_i32_0 : i32, i32, i32
  }
  func.func @transform_1(%arg0: i32) -> (i32, i32) {
    %c0_i32 = arith.constant 0 : i32
    %c0_i32_0 = arith.constant 0 : i32
    %c0_i32_1 = arith.constant 0 : i32
    return %c0_i32, %c0_i32_0 : i32, i32
  }
  func.func @transform_2(%arg0: i32) -> (i32, i32) {
    %c0_i32 = arith.constant 0 : i32
    %c0_i32_0 = arith.constant 0 : i32
    %c0_i32_1 = arith.constant 0 : i32
    return %c0_i32, %c0_i32_0 : i32, i32
  }
  func.func @transform_3(%arg0: i32) -> (i32, i32) {
    %c0_i32 = arith.constant 0 : i32
    %c0_i32_0 = arith.constant 0 : i32
    %c0_i32_1 = arith.constant 0 : i32
    return %c0_i32, %c0_i32_0 : i32, i32
  }
  func.func @transform_4(%arg0: i32) -> (i32, i32) {
    %c0_i32 = arith.constant 0 : i32
    %c0_i32_0 = arith.constant 0 : i32
    %c0_i32_1 = arith.constant 0 : i32
    return %c0_i32, %c0_i32_0 : i32, i32
  }
  func.func @transform_5(%arg0: i32) -> (i32, i32, i32) {
    %c0_i32 = arith.constant 0 : i32
    %c0_i32_0 = arith.constant 0 : i32
    %c0_i32_1 = arith.constant 0 : i32
    %c0_i32_2 = arith.constant 0 : i32
    return %c0_i32, %c0_i32_0, %c0_i32_1 : i32, i32, i32
  }
  func.func @transform_6(%arg0: i32) -> (i32, i32) {
    %c0_i32 = arith.constant 0 : i32
    %c0_i32_0 = arith.constant 0 : i32
    %c0_i32_1 = arith.constant 0 : i32
    return %c0_i32, %c0_i32_0 : i32, i32
  }
  func.func @transform_7(%arg0: i32) -> (i32, i32, i32) {
    %c0_i32 = arith.constant 0 : i32
    %c0_i32_0 = arith.constant 0 : i32
    %c0_i32_1 = arith.constant 0 : i32
    return %arg0, %c0_i32, %c0_i32_0 : i32, i32, i32
  }
}

</mosaic_0001>

<bundles_post_ra>
// kernel: cnn_multiclass_forward.1
= control target key start
LH: loop header
LB: loop body
LE: loop exit
PB: predicated region body
PF: predicated region fallthrough
CT: control target
= control target key end

     0   :  { %12 = vsyncpa [#allocation3], 0  ;;  %s1710_s0 = inlined_call_operand.vmem [shape: bf16[2,256,4], index: 0, kind: input, shape index: {}]   ;;  %s1711_s1 = inlined_call_operand.vmem [shape: bf16[16,2], index: 1, kind: input, shape index: {}]   ;;  %s1712_s2 = inlined_call_operand.vmem [shape: f32[1,2], index: 2, kind: input, shape index: {}]   ;;  %s1713_s3 = inlined_call_operand.vmem [shape: bf16[8,4], index: 3, kind: input, shape index: {}]   ;;  %s1714_s4 = inlined_call_operand.vmem [shape: f32[1,4], index: 4, kind: input, shape index: {}]   ;;  %s1715_s5 = inlined_call_operand.vmem [shape: bf16[16,4,3], index: 5, kind: input, shape index: {}]   ;;  %s1716_s6 = inlined_call_operand.vmem [shape: f32[1,3], index: 6, kind: input, shape index: {}]   ;;  %s1717_s7 = inlined_call_operand.hbm [shape: f32[2,1,3], index: 7, kind: output, shape index: {}]  }
   0x1   :  { %14 = vsyncpa [#allocation3 + $0x1], 0  ;;  %s1475_s24 = smov 0   ;;  %s1477_s25 = smov 0  }
   0x2   :  { %s1479_s26 = smov 0   ;;  %s1481_s27 = smov 0  }
   0x3 LB: > { %s1496_s28 = sadd.s32 4294967295, %s1433_s27   ;;  %s1190_s29 = sadd.s32 4294967294, %s1433_s27   ;;  %s1433_s27 = sphi %s1481_s27, %s1723_s27   ;;  %s1429_s26 = sphi %s1479_s26, %s1722_s26   ;;  %s1425_s25 = sphi %s1477_s25, %s1721_s25   ;;  %s1421_s24 = sphi %s1475_s24, %s1720_s24  }
   0x4   : > { %s1500_s30 = sadd.s32 1, %s1433_s27   ;;  %s179_s8 = sadd.s32 1, %s1429_s26 }
   0x5   : > { %s176_s9 = ssub.s32 %s1433_s27, %s1500_s30  ;;  %p189_p0 = scmp.ne.s32.totalorder %s1429_s26, %s1425_s25 }
   0x6   : > { %p177_p1 = scmp.eq.s32.totalorder %s176_s9, 0  ;;  %p190_p2 = scmp.eq.s32.totalorder %s1496_s28, 1 }
   0x7   : > { %p195_p3 = scmp.ne.s32.totalorder %s1425_s25, %s1421_s24  ;;  %p196_p4 = scmp.eq.s32.totalorder %s1190_s29, 1 }
   0x8   : > { %s1511_s10 = scalar_select %p177_p1, %s1429_s26, %s179_s8  }
   0x9   : > { %p1513_p5 = por %p190_p2, %p189_p0  ;;  %p1517_p6 = por %p196_p4, %p195_p3 }
   0xa   : > { %p1193_p7 = scmp.ge.s32.totalorder %s1433_s27, 1  ;;  %p240_p8 = scmp.lt.s32.totalorder %s1433_s27, 3 }
   0xc   : > { %p241_p9 = pnand %p1193_p7, %p240_p8 }
   0xd   : > { %p271_p10 = scmp.lt.s32.totalorder (!%p241_p9), %s1496_s28, 1  ;;  %s269_s20 = sand.u32 (!%p241_p9), 1, %s1425_s25  }
   0xe   : > { %244 = sbr.rel (%p241_p9) target bundleno = 566 (0x236), region = 48  ;;  %s1131_s23 = scalar_lea.hbm (!%p241_p9), %s1717_s7, %s1496_s28 }
   0xf   : > { %s270_s29 = scalar_lea.vmem (!%p241_p9), [#allocation2], %s269_s20  ;;  %s1135_s9 = sshll.u32 (!%p241_p9), %s1131_s23, 4  ;;  %s1136_s9 = int_to_ptr.hbm [resolvable:$true] %s1135_s9 }
  0x10   : > { %s1133_s8 = sshll.u32 (!%p241_p9), %s270_s29, 4  ;;  %s1123_s13 = scalar_lea.sflag (!%p241_p9), [#allocation3], %s269_s20  ;;  %s1134_s8 = int_to_ptr.vmem [resolvable:$true] %s1133_s8 }
  0x11   : > { %s1385_s14 = sshra.s32 (!%p241_p9), %s1136_s9, 4  ;;  %s1386_s14 = int_to_ptr.hbm [resolvable:$true] %s1385_s14 }
  0x12   : > { %s1387_s15 = scalar_lea.hbm (!%p241_p9), %s1386_s14, 1  ;;  %p1392_p0 = scmp.lt.s32.totalorder (!%p241_p9), %s1386_s14, %s1717_s7 }
  0x13   : > { %v309_v0 = vld [vmem:[%s1711_s1] sm:$0xf]  ;;  %vm349_vm0 = vcmask 1041408   ;;  %v310_v1 = vld [vmem:[%s1711_s1 + $0x4] sm:$0xf]  ;;  %s272_s17 = scalar_select %p271_p10, %s1496_s28, 1 }
  0x14   : > { %v333_v2 = vunpack.c.l.b16 %v309_v0  ;;  %v415_v3 = vsel %vm349_vm0, %v309_v0, 0  ;;  %v479_v4 = vsel %vm349_vm0, %v310_v1, 0  ;;  %v539_v5 = vunpack.c.l.b16 %v310_v1  ;;  %v621_v28 = vld [vmem:[%s1713_s3] sm:$0xf]  ;;  %p1388_p11 = scmp.ne.s32.totalorder %s1386_s14, %s1387_s15 }
  0x15   : > { %424 = vmatpush.bf16.msra.mxu1 %v415_v3  ;;  %488 = vmatpush.bf16.msra.mxu2 %v479_v4  ;;  %s1313_s18 = sshll.u32 %s272_s17, 7  ;;  %vm336_vm1 = vcmask 31744   ;;  %vm636_vm2 = vcmask 1040384   ;;  %v629_v29 = vunpack.c.l.b16 %v621_v28  ;;  %v1578_v46 = vld [vmem:[%s1712_s2] ss:$0 sm:$0xff]  ;;  %vm632_vm3 = vcmask 15360  }
  0x16   : > { %v334_v6 = vpack.c.b16 %v333_v2, %v333_v2  ;;  %v540_v7 = vpack.c.b16 %v539_v5, %v539_v5  ;;  %s1536_s21 = scalar_lea.vmem %s1710_s0, %s1313_s18  ;;  %v663_v30 = vsel %vm636_vm2, %v621_v28, 0  ;;  %vm1120_vm4 = vcmask 16384   ;;  %p1389_p12 = pnand %p1388_p11, %p1513_p5 }
  0x17   : > { %v1314_v10 = vld [vmem:[%s1536_s21] sm:$0xff]  ;;  %v1315_v16 = vld [vmem:[%s1536_s21 + $0x8] sm:$0xff]  ;;  %v1316_v20 = vld [vmem:[%s1536_s21 + $0x10] sm:$0xff]  ;;  %v630_v31 = vpack.c.b16 %v629_v29, %v629_v29  ;;  %s1391_s17 = scalar_lea.hbm %s1717_s7, 2 }
  0x18   : > { %v335_v8 = vrot.slane %v334_v6, 2  ;;  %v541_v9 = vrot.slane %v540_v7, 2  ;;  %v1322_v11 = vld [vmem:[%s1536_s21 + $0x40] sm:$0xff]  ;;  %1232 = vmatmul.msk.bf16.vlgmr.msra.gmra.mxu1 %vm336_vm1, %v1314_v10  ;;  %v1323_v17 = vld [vmem:[%s1536_s21 + $0x48] sm:$0xff]  ;;  %v1324_v21 = vld [vmem:[%s1536_s21 + $0x50] sm:$0xff]  ;;  %p1390_p13 = pneg %p1389_p12  ;;  %p1393_p1 = scmp.lt.s32.totalorder %s1391_s17, %s1387_s15 }
  0x19   : > { %v1318_v14 = vld [vmem:[%s1536_s21 + $0x20] sm:$0xff]  ;;  %1252 = vmatmul.msk.bf16.vlgmr.msra.gmra.mxu2 %vm336_vm1, %v1322_v11  ;;  %v1319_v18 = vld [vmem:[%s1536_s21 + $0x28] sm:$0xff]  ;;  %v1320_v22 = vld [vmem:[%s1536_s21 + $0x30] sm:$0xff]  ;;  %672 = vmatpush.bf16.msrb.mxu1 %v663_v30  ;;  %v684_v32 = vrot.slane %v630_v31, 2  ;;  %v712_v33 = vrot.slane %v630_v31, 3  ;;  %v631_v34 = vrot.slane %v630_v31, 1 }
  0x1a   : > { %v351_v12 = vsel %vm349_vm0, %v335_v8, 0  ;;  %v555_v13 = vsel %vm349_vm0, %v541_v9, 0  ;;  %v1326_v15 = vld [vmem:[%s1536_s21 + $0x60] sm:$0xff]  ;;  %v1327_v19 = vld [vmem:[%s1536_s21 + $0x68] sm:$0xff]  ;;  %v1328_v23 = vld [vmem:[%s1536_s21 + $0x70] sm:$0xff]  ;;  %p1394_p2 = por %p1393_p1, %p1392_p0 }
  0x1b   : > { %360 = vmatpush.bf16.msra.mxu0 %v351_v12  ;;  %564 = vmatpush.bf16.msra.mxu3 %v555_v13  ;;  %v1317_v24 = vld [vmem:[%s1536_s21 + $0x18] sm:$0xff]  ;;  %v689_v35 = vsel %vm636_vm2, %v684_v32, 0  ;;  %v717_v36 = vsel %vm636_vm2, %v712_v33, 0  ;;  %v638_v37 = vsel %vm636_vm2, %v631_v34, 0 }
  0x1c   : > { %v1325_v25 = vld [vmem:[%s1536_s21 + $0x58] sm:$0xff]  ;;  %698 = vmatpush.bf16.msrb.mxu2 %v689_v35  ;;  %p1395_p3 = pnand %p1394_p2, %p1390_p13 }
  0x1d   : > { %v1321_v26 = vld [vmem:[%s1536_s21 + $0x38] sm:$0xff] }
  0x1e   : > { %1212 = vmatmul.msk.bf16.vlgmr.msra.gmra.mxu0 %vm336_vm1, %v1318_v14  ;;  %1272 = vmatmul.msk.bf16.vlgmr.msra.gmra.mxu3 %vm336_vm1, %v1326_v15  ;;  %v1329_v27 = vld [vmem:[%s1536_s21 + $0x78] sm:$0xff] }
  0x1f   : > { %726 = vmatpush.bf16.msrb.mxu3 %v717_v36  ;;  %647 = vmatpush.bf16.msrb.mxu0 %v638_v37 }
  0x28   : > { %1233 = vmatmul.msk.bf16.gmra.mxu1 %vm336_vm1, %v1315_v16 }
  0x29   : > { %1253 = vmatmul.msk.bf16.gmra.mxu2 %vm336_vm1, %v1323_v17 }
  0x2e   : > { %1213 = vmatmul.msk.bf16.gmra.mxu0 %vm336_vm1, %v1319_v18  ;;  %1273 = vmatmul.msk.bf16.gmra.mxu3 %vm336_vm1, %v1327_v19 }
  0x38   : > { %1234 = vmatmul.msk.bf16.gmra.mxu1 %vm336_vm1, %v1316_v20 }
  0x39   : > { %1254 = vmatmul.msk.bf16.gmra.mxu2 %vm336_vm1, %v1324_v21 }
  0x3e   : > { %1214 = vmatmul.msk.bf16.gmra.mxu0 %vm336_vm1, %v1320_v22  ;;  %1274 = vmatmul.msk.bf16.gmra.mxu3 %vm336_vm1, %v1328_v23 }
  0x48   : > { %1235 = vmatmul.msk.bf16.gmra.mxu1 %vm336_vm1, %v1317_v24 }
  0x49   : > { %1255 = vmatmul.msk.bf16.gmra.mxu2 %vm336_vm1, %v1325_v25 }
  0x4e   : > { %1215 = vmatmul.msk.bf16.gmra.mxu0 %vm336_vm1, %v1321_v26  ;;  %1275 = vmatmul.msk.bf16.gmra.mxu3 %vm336_vm1, %v1329_v27 }
  0x95   : > { %v426_v38 = vpop.f32.mrf.mxu1 }
  0x9b   : > { %v362_v39 = vpop.f32.mrf.mxu0 }
  0x9c   : > { %v427_v40 = vadd.f32 %v426_v38, %v362_v39  ;;  %v490_v41 = vpop.f32.mrf.mxu2 }
  0x9d   : > { %v428_v43 = vpop.f32.mrf.mxu1 }
  0x9e   : > { %v510_v42 = vadd.f32 %v490_v41, %v427_v40 }
  0xa1   : > { %v566_v44 = vpop.f32.mrf.mxu3 }
  0xa2   : > { %v586_v45 = vadd.f32 %v566_v44, %v510_v42 }
  0xa3   : > { %v364_v47 = vpop.f32.mrf.mxu0 }
  0xa4   : > { %v429_v48 = vadd.f32 %v428_v43, %v364_v47  ;;  %v597_v49 = vadd.f32 %v1578_v46, %v586_v45  ;;  %v492_v50 = vpop.f32.mrf.mxu2 }
  0xa5   : > { %v431_v52 = vpop.f32.mrf.mxu1 }
  0xa6   : > { %v511_v51 = vadd.f32 %v492_v50, %v429_v48  ;;  %v605_v54 = vmax.f32 %v597_v49, 0.0 }
  0xa8   : > { %v613_v59 = vpack.c.bf16 %v605_v54, %v605_v54 }
  0xa9   : > { %v568_v53 = vpop.f32.mrf.mxu3 }
  0xaa   : > { %v587_v55 = vadd.f32 %v568_v53, %v511_v51  ;;  %v656_v2 = vunpack.c.l.b16 %v613_v59 }
  0xab   : > { %v367_v56 = vpop.f32.mrf.mxu0 }
  0xac   : > { %v598_v57 = vadd.f32 %v1578_v46, %v587_v55  ;;  %v432_v58 = vadd.f32 %v431_v52, %v367_v56  ;;  %v495_v61 = vpop.f32.mrf.mxu2 }
  0xad   : > { %v433_v0 = vpop.f32.mrf.mxu1 }
  0xae   : > { %v606_v60 = vmax.f32 %v598_v57, 0.0  ;;  %v512_v63 = vadd.f32 %v495_v61, %v432_v58 }
  0xb0   : > { %v614_v62 = vpack.c.bf16 %v606_v60, %v606_v60 }
  0xb1   : > { %v571_v1 = vpop.f32.mrf.mxu3 }
  0xb2   : > { %v657_v3 = vunpack.c.l.b16 %v614_v62  ;;  %v588_v4 = vadd.f32 %v571_v1, %v512_v63 }
  0xb3   : > { %v369_v5 = vpop.f32.mrf.mxu0 }
  0xb4   : > { %v658_v6 = vpack.c.b16 %v657_v3, %v656_v2  ;;  %v434_v7 = vadd.f32 %v433_v0, %v369_v5  ;;  %v599_v8 = vadd.f32 %v1578_v46, %v588_v4  ;;  %v497_v9 = vpop.f32.mrf.mxu2  ;;  %v745_v4 = vld [vmem:[%s1715_s5] sm:$0x3] }
  0xb5   : > { %v436_v11 = vpop.f32.mrf.mxu1  ;;  %v750_v5 = vsel %vm349_vm0, %v745_v4, 0 }
  0xb6   : > { %1277 = vmatmul.msk.bf16.vlgmr.msrb.gmra.mxu1 %vm632_vm3, %v658_v6  ;;  %v513_v10 = vadd.f32 %v497_v9, %v434_v7  ;;  %v607_v13 = vmax.f32 %v599_v8, 0.0  ;;  %759 = vmatpush.bf16.msra.mxu0 %v750_v5  ;;  %v1283_v6 = vld [vmem:[%s1715_s5 + $0x4] sm:$0x3]  ;;  %v1281_v7 = vld [vmem:[%s1715_s5 + $0x2] sm:$0x3] }
  0xb7   : > { %v801_v8 = vsel %vm349_vm0, %v1283_v6, 0 }
  0xb8   : > { %v615_v18 = vpack.c.bf16 %v607_v13, %v607_v13  ;;  %810 = vmatpush.bf16.msra.mxu2 %v801_v8  ;;  %v1287_v13 = vld [vmem:[%s1715_s5 + $0x8] sm:$0x3] }
  0xb9   : > { %v573_v12 = vpop.f32.mrf.mxu3 }
  0xba   : > { %v589_v14 = vadd.f32 %v573_v12, %v513_v10  ;;  %v625_v25 = vunpack.c.l.b16 %v615_v18  ;;  %v778_v10 = vsel %vm349_vm0, %v1281_v7, 0  ;;  %v1293_v12 = vld [vmem:[%s1715_s5 + $0xe] sm:$0x3] }
  0xbb   : > { %v372_v15 = vpop.f32.mrf.mxu0  ;;  %787 = vmatpush.bf16.msra.mxu1 %v778_v10 }
  0xbc   : > { %v600_v16 = vadd.f32 %v1578_v46, %v589_v14  ;;  %v437_v17 = vadd.f32 %v436_v11, %v372_v15  ;;  %v500_v20 = vpop.f32.mrf.mxu2  ;;  %v1291_v11 = vld [vmem:[%s1715_s5 + $0xc] sm:$0x3]  ;;  %v916_v15 = vsel %vm349_vm0, %v1293_v12, 0 }
  0xbd   : > { %v438_v23 = vpop.f32.mrf.mxu1  ;;  %v893_v14 = vsel %vm349_vm0, %v1291_v11, 0 }
  0xbe   : > { %v608_v19 = vmax.f32 %v600_v16, 0.0  ;;  %v514_v22 = vadd.f32 %v500_v20, %v437_v17  ;;  %v847_v16 = vsel %vm349_vm0, %v1287_v13, 0  ;;  %v1289_v17 = vld [vmem:[%s1715_s5 + $0xa] sm:$0x3] }
  0xbf   : > { %v870_v18 = vsel %vm349_vm0, %v1289_v17, 0  ;;  %v744_v17 = vld [vmem:[%s1716_s6] sm:$0x1] }
  0xc0   : > { %v616_v21 = vpack.c.bf16 %v608_v19, %v608_v19  ;;  %879 = vmatpush.bf16.msrb.mxu1 %v870_v18 }
  0xc1   : > { %v576_v24 = vpop.f32.mrf.mxu3 }
  0xc2   : > { %v626_v26 = vunpack.c.l.b16 %v616_v21  ;;  %v590_v27 = vadd.f32 %v576_v24, %v514_v22  ;;  %v1370_v24 = vld [vmem:[%s1714_s4] ss:$0 sm:$0xff] }
  0xc3   : > { %v374_v28 = vpop.f32.mrf.mxu0 }
  0xc4   : > { %v627_v29 = vpack.c.b16 %v626_v26, %v625_v25  ;;  %v439_v30 = vadd.f32 %v438_v23, %v374_v28  ;;  %v601_v31 = vadd.f32 %v1578_v46, %v590_v27  ;;  %v502_v32 = vpop.f32.mrf.mxu2  ;;  %v1295_v28 = vld [vmem:[%s1715_s5 + $0x10] sm:$0x3] }
  0xc5   : > { %v441_v34 = vpop.f32.mrf.mxu1 }
  0xc6   : > { %1276 = vmatmul.msk.bf16.vlgmr.msrb.gmra.mxu0 %vm632_vm3, %v627_v29  ;;  %v515_v33 = vadd.f32 %v502_v32, %v439_v30  ;;  %v609_v36 = vmax.f32 %v601_v31, 0.0  ;;  %v938_v31 = vsel %vm349_vm0, %v1295_v28, 0 }
  0xc7   : > { %856 = vmatpush.bf16.msrb.mxu0 %v847_v16 }
  0xc8   : > { %v617_v41 = vpack.c.bf16 %v609_v36, %v609_v36 }
  0xc9   : > { %v578_v35 = vpop.f32.mrf.mxu3 }
  0xca   : > { %v591_v37 = vadd.f32 %v578_v35, %v515_v33  ;;  %v681_v48 = vunpack.c.l.b16 %v617_v41  ;;  %v1299_v33 = vld [vmem:[%s1715_s5 + $0x14] sm:$0x3] }
  0xcb   : > { %v377_v38 = vpop.f32.mrf.mxu0 }
  0xcc   : > { %v602_v39 = vadd.f32 %v1578_v46, %v591_v37  ;;  %v442_v40 = vadd.f32 %v441_v34, %v377_v38  ;;  %v505_v43 = vpop.f32.mrf.mxu2  ;;  %v1297_v34 = vld [vmem:[%s1715_s5 + $0x12] sm:$0x3]  ;;  %v1301_v37 = vld [vmem:[%s1715_s5 + $0x16] sm:$0x3] }
  0xcd   : > { %v443_v51 = vpop.f32.mrf.mxu1  ;;  %v966_v41 = vsel %vm349_vm0, %v1297_v34, 0 }
  0xce   : > { %v610_v42 = vmax.f32 %v602_v39, 0.0  ;;  %v516_v45 = vadd.f32 %v505_v43, %v442_v40  ;;  %v989_v40 = vsel %vm349_vm0, %v1299_v33, 0 }
  0xd0   : > { %v618_v44 = vpack.c.bf16 %v610_v42, %v610_v42 }
  0xd1   : > { %v581_v47 = vpop.f32.mrf.mxu3 }
  0xd2   : > { %v682_v49 = vunpack.c.l.b16 %v618_v44  ;;  %v592_v50 = vadd.f32 %v581_v47, %v516_v45  ;;  %v1012_v47 = vsel %vm349_vm0, %v1301_v37, 0 }
  0xd3   : > { %v379_v52 = vpop.f32.mrf.mxu0 }
  0xd4   : > { %v683_v53 = vpack.c.b16 %v682_v49, %v681_v48  ;;  %v444_v54 = vadd.f32 %v443_v51, %v379_v52  ;;  %v603_v55 = vadd.f32 %v1578_v46, %v592_v50  ;;  %v507_v56 = vpop.f32.mrf.mxu2  ;;  %v1303_v51 = vld [vmem:[%s1715_s5 + $0x18] sm:$0x3] }
  0xd6   : > { %1278 = vmatmul.msk.bf16.vlgmr.msrb.gmra.mxu2 %vm632_vm3, %v683_v53  ;;  %v517_v57 = vadd.f32 %v507_v56, %v444_v54  ;;  %v611_v59 = vmax.f32 %v603_v55, 0.0  ;;  %v1035_v54 = vsel %vm349_vm0, %v1303_v51, 0  ;;  %v1307_v55 = vld [vmem:[%s1715_s5 + $0x1c] sm:$0x3]  ;;  %v1305_v56 = vld [vmem:[%s1715_s5 + $0x1a] sm:$0x3] }
  0xd7   : > { %902 = vmatpush.bf16.msrb.mxu2 %v893_v14 }
  0xd8   : > { %v619_v62 = vpack.c.bf16 %v611_v59, %v611_v59 }
  0xd9   : > { %v583_v58 = vpop.f32.mrf.mxu3 }
  0xda   : > { %v593_v60 = vadd.f32 %v583_v58, %v517_v57  ;;  %v709_v1 = vunpack.c.l.b16 %v619_v62  ;;  %v1309_v58 = vld [vmem:[%s1715_s5 + $0x1e] sm:$0x3]  ;;  %v1058_v62 = vsel %vm349_vm0, %v1305_v56, 0 }
  0xdc   : > { %v604_v61 = vadd.f32 %v1578_v46, %v593_v60  ;;  %v1285_v46 = vld [vmem:[%s1715_s5 + $0x6] sm:$0x3] }
  0xdd   : > { %v824_v9 = vsel %vm349_vm0, %v1285_v46, 0 }
  0xde   : > { %v612_v63 = vmax.f32 %v604_v61, 0.0  ;;  %833 = vmatpush.bf16.msra.mxu3 %v824_v9  ;;  %v1081_v61 = vsel %vm349_vm0, %v1307_v55, 0 }
  0xe0   : > { %v620_v0 = vpack.c.bf16 %v612_v63, %v612_v63 }
  0xe2   : > { %v710_v2 = vunpack.c.l.b16 %v620_v0 }
  0xe4   : > { %v711_v3 = vpack.c.b16 %v710_v2, %v709_v1  ;;  %v1104_v1 = vsel %vm349_vm0, %v1309_v58, 0 }
  0xe6   : > { %1279 = vmatmul.msk.bf16.vlgmr.msrb.gmra.mxu3 %vm632_vm3, %v711_v3 }
  0xe7   : > { %925 = vmatpush.bf16.msrb.mxu3 %v916_v15 }
 0x133   : > { %v674_v20 = vpop.f32.mrf.mxu1 }
 0x13b   : > { %v676_v42 = vpop.f32.mrf.mxu1 }
 0x143   : > { %v649_v19 = vpop.f32.mrf.mxu0 }
 0x144   : > { %v675_v22 = vadd.f32 %v674_v20, %v649_v19 }
 0x14b   : > { %v651_v36 = vpop.f32.mrf.mxu0 }
 0x14c   : > { %v677_v44 = vadd.f32 %v676_v42, %v651_v36 }
 0x159   : > { %v700_v21 = vpop.f32.mrf.mxu2 }
 0x15a   : > { %v705_v23 = vadd.f32 %v700_v21, %v675_v22 }
 0x161   : > { %v702_v43 = vpop.f32.mrf.mxu2 }
 0x162   : > { %v706_v49 = vadd.f32 %v702_v43, %v677_v44 }
 0x169   : > { %v728_v25 = vpop.f32.mrf.mxu3 }
 0x16a   : > { %v733_v26 = vadd.f32 %v728_v25, %v705_v23 }
 0x16c   : > { %v738_v27 = vadd.f32 %v1370_v24, %v733_v26 }
 0x16e   : > { %v740_v29 = vmax.f32 %v738_v27, 0.0 }
 0x170   : > { %v742_v30 = vpack.c.bf16 %v740_v29, %v740_v29 }
 0x171   : > { %v730_v48 = vpop.f32.mrf.mxu3 }
 0x172   : > { %v769_v32 = vunpack.c.l.b16 %v742_v30  ;;  %1280 = vmatmul.msk.bf16.vlgmr.msra.gmra.mxu0 %vm336_vm1, %v742_v30  ;;  %v734_v50 = vadd.f32 %v730_v48, %v706_v49 }
 0x173   : > { %947 = vmatpush.bf16.msra.mxu0 %v938_v31 }
 0x174   : > { %v770_v35 = vpack.c.b16 %v769_v32, %v769_v32  ;;  %v739_v52 = vadd.f32 %v1370_v24, %v734_v50 }
 0x176   : > { %v772_v38 = vshrl.u32 %v770_v35, 16  ;;  %v796_v39 = vrot.slane %v770_v35, 1  ;;  %v842_v53 = vrot.slane %v770_v35, 2  ;;  %v741_v57 = vmax.f32 %v739_v52, 0.0 }
 0x177   : > { %v888_v60 = vrot.slane %v770_v35, 3 }
 0x178   : > { %1282 = vmatmul.msk.bf16.vlgmr.msra.gmra.mxu1 %vm336_vm1, %v772_v38  ;;  %1284 = vmatmul.msk.bf16.vlgmr.msra.gmra.mxu2 %vm336_vm1, %v796_v39  ;;  %v819_v45 = vrot.slane %v772_v38, 1  ;;  %v865_v59 = vrot.slane %v772_v38, 2  ;;  %v743_v63 = vpack.c.bf16 %v741_v57, %v741_v57  ;;  %v911_v0 = vrot.slane %v772_v38, 3 }
 0x179   : > { %998 = vmatpush.bf16.msra.mxu2 %v989_v40  ;;  %975 = vmatpush.bf16.msra.mxu1 %v966_v41 }
 0x17a   : > { %1286 = vmatmul.msk.bf16.vlgmr.msra.gmra.mxu3 %vm336_vm1, %v819_v45  ;;  %v957_v2 = vunpack.c.l.b16 %v743_v63 }
 0x17b   : > { %1021 = vmatpush.bf16.msra.mxu3 %v1012_v47 }
 0x17c   : > { %v958_v3 = vpack.c.b16 %v957_v2, %v957_v2 }
 0x17e   : > { %v960_v4 = vshrl.u32 %v958_v3, 16  ;;  %v984_v5 = vrot.slane %v958_v3, 1  ;;  %v1030_v46 = vrot.slane %v958_v3, 2  ;;  %v1076_v8 = vrot.slane %v958_v3, 3 }
 0x180   : > { %v1007_v6 = vrot.slane %v960_v4, 1  ;;  %v1053_v7 = vrot.slane %v960_v4, 2  ;;  %v1099_v9 = vrot.slane %v960_v4, 3 }
 0x182   : > { %1288 = vmatmul.msk.bf16.vlgmr.msrb.gmra.mxu0 %vm336_vm1, %v842_v53 }
 0x183   : > { %1044 = vmatpush.bf16.msrb.mxu0 %v1035_v54 }
 0x188   : > { %1290 = vmatmul.msk.bf16.vlgmr.msrb.gmra.mxu1 %vm336_vm1, %v865_v59  ;;  %1292 = vmatmul.msk.bf16.vlgmr.msrb.gmra.mxu2 %vm336_vm1, %v888_v60 }
 0x189   : > { %1090 = vmatpush.bf16.msrb.mxu2 %v1081_v61  ;;  %1067 = vmatpush.bf16.msrb.mxu1 %v1058_v62 }
 0x18a   : > { %1294 = vmatmul.msk.bf16.vlgmr.msrb.gmra.mxu3 %vm336_vm1, %v911_v0 }
 0x18b   : > { %1113 = vmatpush.bf16.msrb.mxu3 %v1104_v1 }
 0x192   : > { %1296 = vmatmul.msk.bf16.vlgmr.msra.gmra.mxu0 %vm336_vm1, %v743_v63 }
 0x198   : > { %1298 = vmatmul.msk.bf16.vlgmr.msra.gmra.mxu1 %vm336_vm1, %v960_v4  ;;  %1300 = vmatmul.msk.bf16.vlgmr.msra.gmra.mxu2 %vm336_vm1, %v984_v5 }
 0x19a   : > { %1302 = vmatmul.msk.bf16.vlgmr.msra.gmra.mxu3 %vm336_vm1, %v1007_v6 }
 0x1a2   : > { %1304 = vmatmul.msk.bf16.vlgmr.msrb.gmra.mxu0 %vm336_vm1, %v1030_v46 }
 0x1a8   : > { %1306 = vmatmul.msk.bf16.vlgmr.msrb.gmra.mxu1 %vm336_vm1, %v1053_v7  ;;  %1308 = vmatmul.msk.bf16.vlgmr.msrb.gmra.mxu2 %vm336_vm1, %v1076_v8 }
 0x1aa   : > { %1310 = vmatmul.msk.bf16.vlgmr.msrb.gmra.mxu3 %vm336_vm1, %v1099_v9 }
 0x1ef   : > { %v761_v10 = vpop.f32.mrf.mxu0 }
 0x1f0   : > { %v765_v19 = vadd.f32 %v761_v10, %v744_v17 }
 0x1f5   : > { %v789_v11 = vpop.f32.mrf.mxu1 }
 0x1f6   : > { %v793_v22 = vadd.f32 %v789_v11, %v765_v19 }
 0x1f7   : > { %v763_v12 = vpop.f32.mrf.mxu0 }
 0x1fb   : > { %v812_v13 = vpop.f32.mrf.mxu2 }
 0x1fc   : > { %v816_v24 = vadd.f32 %v812_v13, %v793_v22 }
 0x1fd   : > { %v791_v14 = vpop.f32.mrf.mxu1  ;;  %v835_v15 = vpop.f32.mrf.mxu3 }
 0x1fe   : > { %v839_v26 = vadd.f32 %v835_v15, %v816_v24 }
 0x1ff   : > { %v858_v16 = vpop.f32.mrf.mxu0 }
 0x200   : > { %v862_v30 = vadd.f32 %v858_v16, %v839_v26 }
 0x203   : > { %v814_v18 = vpop.f32.mrf.mxu2 }
 0x205   : > { %v837_v20 = vpop.f32.mrf.mxu3  ;;  %v881_v21 = vpop.f32.mrf.mxu1 }
 0x206   : > { %v885_v31 = vadd.f32 %v881_v21, %v862_v30 }
 0x207   : > { %v860_v23 = vpop.f32.mrf.mxu0 }
 0x20b   : > { %v904_v25 = vpop.f32.mrf.mxu2 }
 0x20c   : > { %v908_v33 = vadd.f32 %v904_v25, %v885_v31 }
 0x20d   : > { %v883_v27 = vpop.f32.mrf.mxu1  ;;  %v927_v28 = vpop.f32.mrf.mxu3 }
 0x20e   : > { %v931_v37 = vadd.f32 %v927_v28, %v908_v33 }
 0x20f   : > { %v949_v29 = vpop.f32.mrf.mxu0 }
 0x210   : > { %v953_v39 = vadd.f32 %v949_v29, %v931_v37 }
 0x213   : > { %v906_v32 = vpop.f32.mrf.mxu2 }
 0x215   : > { %v929_v34 = vpop.f32.mrf.mxu3  ;;  %v977_v35 = vpop.f32.mrf.mxu1 }
 0x216   : > { %v981_v42 = vadd.f32 %v977_v35, %v953_v39 }
 0x217   : > { %v951_v36 = vpop.f32.mrf.mxu0 }
 0x21b   : > { %v1000_v38 = vpop.f32.mrf.mxu2 }
 0x21c   : > { %v1004_v44 = vadd.f32 %v1000_v38, %v981_v42 }
 0x21d   : > { %v979_v40 = vpop.f32.mrf.mxu1  ;;  %v1023_v41 = vpop.f32.mrf.mxu3 }
 0x21e   : > { %v1027_v47 = vadd.f32 %v1023_v41, %v1004_v44 }
 0x21f   : > { %v1046_v43 = vpop.f32.mrf.mxu0 }
 0x220   : > { %v1050_v51 = vadd.f32 %v1046_v43, %v1027_v47 }
 0x223   : > { %v1002_v45 = vpop.f32.mrf.mxu2 }
 0x225   : > { %v1025_v48 = vpop.f32.mrf.mxu3  ;;  %v1069_v49 = vpop.f32.mrf.mxu1 }
 0x226   : > { %v1073_v52 = vadd.f32 %v1069_v49, %v1050_v51 }
 0x227   : > { %v1048_v50 = vpop.f32.mrf.mxu0 }
 0x22b   : > { %v1092_v53 = vpop.f32.mrf.mxu2 }
 0x22c   : > { %v1096_v54 = vadd.f32 %v1092_v53, %v1073_v52 }
 0x22d   : > { %v1071_v55 = vpop.f32.mrf.mxu1  ;;  %v1115_v56 = vpop.f32.mrf.mxu3 }
 0x22e   : > { %v1119_v57 = vadd.f32 %v1115_v56, %v1096_v54 }
 0x230   : > { %1121 = vst.msk [vmem:[%s270_s29] sm:$0x1] %vm1120_vm4, %v1119_v57 }
 0x231   : > { %1398 = shalt.err (!%p1395_p3)
}
 0x232   : > { %1330 = dma.vmem_to_hbm [thread:$0]  (%p1513_p5), %s1134_s8, 16, %s1136_s9, %s1123_s13  }
 0x233   : > { %v1094_v58 = vpop.f32.mrf.mxu2 }
 0x235   : > { %v1117_v59 = vpop.f32.mrf.mxu3 }
 0x236 PF: > { %p1336_p4 = scmp.ge.s32.totalorder %s1433_s27, 2  ;;  %s1147_s20 = sand.u32 1, %s1421_s24  }
 0x237   : > { %s1148_s21 = scalar_lea.sflag [#allocation3], %s1147_s20 }
 0x238   : > { %p1333_p7 = pnand %p1336_p4, %p1517_p6 }
 0x23a   : > { %p1334_p8 = pneg %p1333_p7 }
 0x23c   : > { %1416 = dma.done.wait (%p1334_p8), %s1148_s21, 16  }
 0x23d   : > { %1418 = vsyncadd (%p1334_p8), %s1148_s21, 4294967280  ;;  %p17_p5 = scmp.ge.s32.totalorder %s1500_s30, 4   ;;  %s1720_s24 = smov %s1425_s25 }
 0x23e   : > { %s1721_s25 = smov %s1429_s26  ;;  %s1722_s26 = smov %s1511_s10 }
 0x23f   : > { %s1723_s27 = smov %s1500_s30  ;;  %19 = sbr.rel (!%p17_p5) target bundleno = 3 (0x3), region = 98 }
 0x244   :  { %1153 = vsyncpa [#allocation3], 1 }
 0x245   :  { %1155 = vsyncpa [#allocation3 + $0x1], 1 }

</bundles_post_ra>
